<compile_context>
chip_gen: v7x
topology: tpu7x:2x2x1
jax: 0.10.0
libtpu: 0.0.40
codegen_flags: <defaults>
</compile_context>

<pallas_src>
import functools

import jax
import jax.numpy as jnp
from jax import lax
from jax.experimental import pallas as pl
from jax.experimental.pallas import tpu as pltpu

LANES = 128  # padded lane width for every operand and the output slab


def _ppo_kernel(x_ref, w_ref, out_ref, *, input_dim, output_dim):
    P = LANES
    IN = input_dim
    b_row = IN + 2 * P  # first bias row inside the packed slab (8-aligned)

    x = x_ref[...]  # [B, IN]

    # One vld for all three bias rows (rows 0..2 of this [8, 128] block).
    bias_blk = w_ref[b_row:b_row + 8, :]      # [8, 128]
    b1 = bias_blk[0:1, :]
    b2 = bias_blk[1:2, :]
    b3 = bias_blk[2:3, :]

    # ---- layer 1 (fused actor|critic): x @ [wa1|wc1] + [ba1|bc1], ReLU
    w1 = w_ref[0:IN, :]                       # [IN, 128]
    h = jnp.dot(x, w1, preferred_element_type=jnp.float32) + b1
    h = jnp.maximum(h, 0.0)                   # pad lanes stay exactly 0

    # ---- layer 2: block-diagonal (wa2, wc2)
    w2 = w_ref[IN:IN + P, :]                  # [128, 128]
    h = jnp.dot(h, w2, preferred_element_type=jnp.float32) + b2
    h = jnp.maximum(h, 0.0)

    # ---- layer 3: block-diagonal (wa3, wc3)
    #      lanes [0, OUT) = actor logits, lane OUT = critic value, rest 0
    w3 = w_ref[IN + P:IN + 2 * P, :]          # [128, 128]
    z = jnp.dot(h, w3, preferred_element_type=jnp.float32) + b3   # [B, 128]

    # ---- masked, numerically stable softmax over the logit lanes only
    lane = lax.broadcasted_iota(jnp.int32, z.shape, 1)
    logits = jnp.where(lane < output_dim, z, -1e30)
    m = jnp.max(logits, axis=-1, keepdims=True)
    e = jnp.exp(logits - m)                   # exact 0 on masked lanes
    s = jnp.sum(e, axis=-1, keepdims=True)
    probs = e * pl.reciprocal(s, approx=False)

    # ---- lane-dense combined output slab (single unmasked store)
    out_ref[...] = jnp.where(lane == output_dim, z, probs)


def pack_params(p, input_dim, hidden_dim, output_dim):
    """Pack all weights/biases into one [IN + 2*128 + 8, 128] f32 slab (done once)."""
    P = LANES
    H = hidden_dim
    IN = input_dim
    OUT = output_dim
    assert 2 * H <= P and OUT + 1 <= P
    assert IN % 8 == 0, "pad input_dim to a multiple of 8 before packing"

    rows = IN + 2 * P + 8                     # 280 for the defaults (multiple of 8)
    slab = jnp.zeros((rows, P), jnp.float32)

    # layer 1: [wa1 | wc1] in rows [0, IN)
    slab = slab.at[0:IN, 0:H].set(p["wa1"])
    slab = slab.at[0:IN, H:2 * H].set(p["wc1"])

    # layer 2: blockdiag(wa2, wc2) in rows [IN, IN + P)
    slab = slab.at[IN:IN + H, 0:H].set(p["wa2"])
    slab = slab.at[IN + H:IN + 2 * H, H:2 * H].set(p["wc2"])

    # layer 3: blockdiag(wa3, wc3) in rows [IN + P, IN + 2P)
    r3 = IN + P
    slab = slab.at[r3:r3 + H, 0:OUT].set(p["wa3"])
    slab = slab.at[r3 + H:r3 + 2 * H, OUT:OUT + 1].set(p["wc3"])

    # biases: one row each, starting at the (8-aligned) row IN + 2P
    br = IN + 2 * P
    slab = slab.at[br, 0:H].set(p["ba1"][0])
    slab = slab.at[br, H:2 * H].set(p["bc1"][0])
    slab = slab.at[br + 1, 0:H].set(p["ba2"][0])
    slab = slab.at[br + 1, H:2 * H].set(p["bc2"][0])
    slab = slab.at[br + 2, 0:OUT].set(p["ba3"][0])
    slab = slab.at[br + 2, OUT:OUT + 1].set(p["bc3"][0])
    return slab


@functools.partial(jax.jit, static_argnames=("input_dim", "hidden_dim", "output_dim"))
def ppo_forward(x, packed_w, *, input_dim, hidden_dim, output_dim):
    """x: [B, input_dim] f32, packed_w: pack_params() slab. Returns (probs, value)."""
    del hidden_dim  # folded into the packed slab
    B = x.shape[0]
    P = LANES

    kernel = functools.partial(
        _ppo_kernel, input_dim=input_dim, output_dim=output_dim)

    flops = 2 * B * (input_dim * P + P * P + P * P) + 6 * B * P
    bytes_accessed = 4 * (x.size + packed_w.size + B * P)
    transcendentals = B * P                   # exp + reciprocal

    vmem = pl.BlockSpec(memory_space=pltpu.MemorySpace.VMEM)
    out = pl.pallas_call(
        kernel,
        out_shape=jax.ShapeDtypeStruct((B, P), jnp.float32),
        in_specs=[vmem, vmem],
        out_specs=vmem,
        cost_estimate=pl.CostEstimate(
            flops=flops,
            transcendentals=transcendentals,
            bytes_accessed=bytes_accessed),
        compiler_params=pltpu.CompilerParams(),
    )(x, packed_w)

    probs = out[:, :output_dim]
    value = out[:, output_dim:output_dim + 1]
    return probs, value


def init_params(key, input_dim, hidden_dim, output_dim):
    """Deterministic synthetic parameters (weights stored as [in, out])."""
    ks = jax.random.split(key, 12)
    s = 0.1

    def w(k, shape):
        return (s * jax.random.normal(k, shape)).astype(jnp.float32)

    return {
        # actor
        "wa1": w(ks[0], (input_dim, hidden_dim)),
        "ba1": w(ks[1], (1, hidden_dim)),
        "wa2": w(ks[2], (hidden_dim, hidden_dim)),
        "ba2": w(ks[3], (1, hidden_dim)),
        "wa3": w(ks[4], (hidden_dim, output_dim)),
        "ba3": w(ks[5], (1, output_dim)),
        # critic
        "wc1": w(ks[6], (input_dim, hidden_dim)),
        "bc1": w(ks[7], (1, hidden_dim)),
        "wc2": w(ks[8], (hidden_dim, hidden_dim)),
        "bc2": w(ks[9], (1, hidden_dim)),
        "wc3": w(ks[10], (hidden_dim, 1)),
        "bc3": w(ks[11], (1, 1)),
    }


def _reference(x, p):
    """Plain-JAX reference matching the PyTorch module semantics."""
    ha = jax.nn.relu(x @ p["wa1"] + p["ba1"])
    ha = jax.nn.relu(ha @ p["wa2"] + p["ba2"])
    probs = jax.nn.softmax(ha @ p["wa3"] + p["ba3"], axis=-1)
    hc = jax.nn.relu(x @ p["wc1"] + p["bc1"])
    hc = jax.nn.relu(hc @ p["wc2"] + p["bc2"])
    value = hc @ p["wc3"] + p["bc3"]
    return probs, value


if __name__ == "__main__":
    batch = 8
    input_dim = 16
    hidden_dim = 32
    output_dim = 4

    key = jax.random.PRNGKey(0)
    k_x, k_p = jax.random.split(key)
    x = jax.random.normal(k_x, (batch, input_dim), dtype=jnp.float32)
    params = init_params(k_p, input_dim, hidden_dim, output_dim)
    packed_w = pack_params(params, input_dim, hidden_dim, output_dim)

    probs, value = ppo_forward(
        x, packed_w,
        input_dim=input_dim, hidden_dim=hidden_dim, output_dim=output_dim)
    jax.block_until_ready((probs, value))

    ref_probs, ref_value = _reference(x, params)
    assert probs.shape == (batch, output_dim)
    assert value.shape == (batch, 1)
    assert jnp.allclose(probs, ref_probs, atol=1e-5, rtol=1e-5)
    assert jnp.allclose(value, ref_value, atol=1e-5, rtol=1e-5)
    assert jnp.allclose(jnp.sum(probs, axis=-1), 1.0, atol=1e-5)

    print("KERNEL_OK")
</pallas_src>

<mosaic_0001>
module attributes {stable_mosaic.version = 11 : i64} {
  func.func @_ppo_kernel(%arg0: memref<8x16xf32, #tpu.memory_space<vmem>>, %arg1: memref<280x128xf32, #tpu.memory_space<vmem>>, %arg2: memref<8x128xf32, #tpu.memory_space<vmem>>) attributes {dimension_semantics = [], scalar_prefetch = 0 : i64, scratch_operands = 0 : i64, tpu.core_type = #tpu.core_type<tc>} {
    %c0 = arith.constant 0 : index
    %c0_0 = arith.constant 0 : index
    %0 = vector.load %arg0[%c0, %c0_0] : memref<8x16xf32, #tpu.memory_space<vmem>>, vector<8x16xf32>
    %c272 = arith.constant 272 : index
    %c0_1 = arith.constant 0 : index
    %1 = vector.load %arg1[%c272, %c0_1] : memref<280x128xf32, #tpu.memory_space<vmem>>, vector<8x128xf32>
    %2 = vector.extract_strided_slice %1 {offsets = [0, 0], sizes = [1, 128], strides = [1, 1]} : vector<8x128xf32> to vector<1x128xf32>
    %3 = vector.extract_strided_slice %1 {offsets = [1, 0], sizes = [1, 128], strides = [1, 1]} : vector<8x128xf32> to vector<1x128xf32>
    %4 = vector.extract_strided_slice %1 {offsets = [2, 0], sizes = [1, 128], strides = [1, 1]} : vector<8x128xf32> to vector<1x128xf32>
    %c0_2 = arith.constant 0 : index
    %c0_3 = arith.constant 0 : index
    %5 = vector.load %arg1[%c0_2, %c0_3] : memref<280x128xf32, #tpu.memory_space<vmem>>, vector<16x128xf32>
    %cst = arith.constant dense<0.000000e+00> : vector<8x128xf32>
    %6 = tpu.matmul %0, %5, %cst {dimension_numbers = #tpu.dot_dimension_numbers<[1], [0], [0], [1], [0, 0, 1, 1], [], []>} : vector<8x16xf32>, vector<16x128xf32>, vector<8x128xf32> -> vector<8x128xf32>
    %7 = vector.broadcast %2 : vector<1x128xf32> to vector<8x128xf32>
    %8 = arith.addf %6, %7 : vector<8x128xf32>
    %cst_4 = arith.constant 0.000000e+00 : f32
    %9 = vector.broadcast %cst_4 : f32 to vector<8x128xf32>
    %10 = arith.maximumf %8, %9 : vector<8x128xf32>
    %c16 = arith.constant 16 : index
    %c0_5 = arith.constant 0 : index
    %11 = vector.load %arg1[%c16, %c0_5] : memref<280x128xf32, #tpu.memory_space<vmem>>, vector<128x128xf32>
    %cst_6 = arith.constant dense<0.000000e+00> : vector<8x128xf32>
    %12 = tpu.matmul %10, %11, %cst_6 {dimension_numbers = #tpu.dot_dimension_numbers<[1], [0], [0], [1], [0, 0, 1, 1], [], []>} : vector<8x128xf32>, vector<128x128xf32>, vector<8x128xf32> -> vector<8x128xf32>
    %13 = vector.broadcast %3 : vector<1x128xf32> to vector<8x128xf32>
    %14 = arith.addf %12, %13 : vector<8x128xf32>
    %cst_7 = arith.constant 0.000000e+00 : f32
    %15 = vector.broadcast %cst_7 : f32 to vector<8x128xf32>
    %16 = arith.maximumf %14, %15 : vector<8x128xf32>
    %c144 = arith.constant 144 : index
    %c0_8 = arith.constant 0 : index
    %17 = vector.load %arg1[%c144, %c0_8] : memref<280x128xf32, #tpu.memory_space<vmem>>, vector<128x128xf32>
    %cst_9 = arith.constant dense<0.000000e+00> : vector<8x128xf32>
    %18 = tpu.matmul %16, %17, %cst_9 {dimension_numbers = #tpu.dot_dimension_numbers<[1], [0], [0], [1], [0, 0, 1, 1], [], []>} : vector<8x128xf32>, vector<128x128xf32>, vector<8x128xf32> -> vector<8x128xf32>
    %19 = vector.broadcast %4 : vector<1x128xf32> to vector<8x128xf32>
    %20 = arith.addf %18, %19 : vector<8x128xf32>
    %21 = tpu.iota {dimensions = array<i32: 1>} : vector<8x128xi32>
    %c4_i32 = arith.constant 4 : i32
    %22 = vector.broadcast %c4_i32 : i32 to vector<8x128xi32>
    %23 = arith.cmpi slt, %21, %22 : vector<8x128xi32>
    %cst_10 = arith.constant -1.000000e+30 : f32
    %24 = vector.broadcast %cst_10 : f32 to vector<8x128xf32>
    %25 = arith.select %23, %20, %24 : vector<8x128xi1>, vector<8x128xf32>
    %cst_11 = arith.constant dense<0xFF800000> : vector<8xf32>
    %26 = vector.multi_reduction <maximumf>, %25, %cst_11 [1] : vector<8x128xf32> to vector<8xf32>
    %27 = vector.shape_cast %26 : vector<8xf32> to vector<8x1xf32>
    %28 = vector.broadcast %27 : vector<8x1xf32> to vector<8x128xf32>
    %29 = arith.subf %25, %28 : vector<8x128xf32>
    %30 = math.exp %29 : vector<8x128xf32>
    %cst_12 = arith.constant dense<0.000000e+00> : vector<8xf32>
    %31 = vector.multi_reduction <add>, %30, %cst_12 [1] : vector<8x128xf32> to vector<8xf32>
    %32 = vector.shape_cast %31 : vector<8xf32> to vector<8x1xf32>
    %33 = tpu.reciprocal %32 : vector<8x1xf32> -> vector<8x1xf32>
    %34 = vector.broadcast %33 : vector<8x1xf32> to vector<8x128xf32>
    %35 = arith.mulf %30, %34 : vector<8x128xf32>
    %c4_i32_13 = arith.constant 4 : i32
    %36 = vector.broadcast %c4_i32_13 : i32 to vector<8x128xi32>
    %37 = arith.cmpi eq, %21, %36 : vector<8x128xi32>
    %38 = arith.select %37, %20, %35 : vector<8x128xi1>, vector<8x128xf32>
    %c0_14 = arith.constant 0 : index
    %c0_15 = arith.constant 0 : index
    %39 = vector.load %arg2[%c0_14, %c0_15] : memref<8x128xf32, #tpu.memory_space<vmem>>, vector<8x128xf32>
    tpu.vector_store %arg2[%c0_14, %c0_15], %38 {strides = array<i32>} : memref<8x128xf32, #tpu.memory_space<vmem>>, vector<8x128xf32>,
    return
  }
}

</mosaic_0001>

<bundles_post_ra>
// kernel: ppo_forward.1
= control target key start
LH: loop header
LB: loop body
LE: loop exit
PB: predicated region body
PF: predicated region fallthrough
CT: control target
= control target key end

     0   :  { %7 = vsyncpa [#allocation3], 0  ;;  %s624_s0 = inlined_call_operand.hbm [shape: f32[8,16], index: 0, kind: input, shape index: {}]   ;;  %s625_s1 = inlined_call_operand.hbm [shape: f32[280,128], index: 1, kind: input, shape index: {}]   ;;  %s626_s2 = inlined_call_operand.vmem [shape: f32[8,128], index: 2, kind: output, shape index: {}]  }
   0x1   :  { %8 = vsyncpa [#allocation5], 0  ;;  %s548_s9 = smov [#allocation2]   ;;  %s549_s11 = smov [#allocation4]  }
   0x2   :  { %s15_s10 = sshll.u32 %s548_s9, 4  ;;  %s24_s12 = sshll.u32 %s549_s11, 4  ;;  %s16_s10 = int_to_ptr.vmem [resolvable:$true] %s15_s10  ;;  %s570_s12 = int_to_ptr.vmem [resolvable:$true] %s24_s12 }
   0x3   :  { %s500_s15 = scalar_lea.hbm %s624_s0, 128 }
   0x4   :  { %p501_p0 = scmp.ne.s32.totalorder %s624_s0, %s500_s15  ;;  %p504_p1 = scmp.lt.u32.totalorder %s500_s15, %s624_s0 }
   0x6   :  { %p506_p2 = pnand %p504_p1, %p501_p0 }
   0x8   :  { %509 = shalt.err (!%p506_p2)
}
   0x9   :  { %s510_s20 = scalar_lea.vmem %s16_s10, 128  ;;  %p515_p4 = scmp.lt.s32.totalorder %s16_s10, %s16_s10 }
   0xa   :  { %p511_p3 = scmp.ne.s32.totalorder %s16_s10, %s510_s20  ;;  %p516_p5 = scmp.lt.s32.totalorder %s510_s20, %s510_s20 }
   0xc   :  { %p517_p6 = por %p516_p5, %p515_p4 }
   0xe   :  { %p518_p7 = pnand %p517_p6, %p511_p3 }
  0x10   :  { %521 = shalt.err (!%p518_p7)
}
  0x11   :  { %18 = dma.hbm_to_vmem [thread:$0]  %s624_s0, 128, %s16_s10, [#allocation3]  }
  0x12   :  { %s522_s25 = scalar_lea.hbm %s625_s1, 4480 }
  0x13   :  { %p523_p8 = scmp.ne.s32.totalorder %s625_s1, %s522_s25  ;;  %p526_p9 = scmp.lt.u32.totalorder %s522_s25, %s625_s1 }
  0x15   :  { %p528_p10 = pnand %p526_p9, %p523_p8 }
  0x17   :  { %531 = shalt.err (!%p528_p10)
}
  0x18   :  { %s532_s30 = scalar_lea.vmem %s570_s12, 4480  ;;  %p537_p12 = scmp.lt.s32.totalorder %s570_s12, %s570_s12 }
  0x19   :  { %p533_p11 = scmp.ne.s32.totalorder %s570_s12, %s532_s30  ;;  %p538_p13 = scmp.lt.s32.totalorder %s532_s30, %s532_s30 }
  0x1b   :  { %p539_p0 = por %p538_p13, %p537_p12 }
  0x1d   :  { %p540_p1 = pnand %p539_p0, %p533_p11 }
  0x1f   :  { %543 = shalt.err (!%p540_p1)
}
  0x20   :  { %s550_s0 = smov 128   ;;  %s551_s3 = smov 8  }
  0x21   :  { %30 = dma.hbm_to_vmem [thread:$0]  %s625_s1, 4480, %s570_s12, [#allocation5], %s550_s0, %s550_s0, %s551_s3  }
  0x22   :  { %544 = dma.done.wait [#allocation3], 128  }
  0x23   :  { %545 = vsyncadd [#allocation3], 4294967168 }
  0x24   :  { %546 = dma.done.wait [#allocation5], 4480  }
  0x25   :  { %547 = vsyncadd [#allocation5], 4294962816  ;;  %v552_v0 = vmov 0.0|0.0   ;;  %vm553_vm0 = vmmov 0   ;;  %v554_v1 = vmov 0.0   ;;  %v39_v2 = vld [vmem:[#allocation4] sm:$0xff]  ;;  %v41_v51 = vlaneseq }
  0x26   :  { %438 = vmatprep.subr.bf16.mxu0 %v552_v0  ;;  %365 = vmatprep.mubr.msk.f32.mxu0 %vm553_vm0, %v554_v1  ;;  %v40_v3 = vld [vmem:[#allocation4 + $0x8] sm:$0xff]  ;;  %v120_v5 = vld [vmem:[#allocation4 + $0x10] sm:$0xff]  ;;  %v121_v6 = vld [vmem:[#allocation4 + $0x18] sm:$0xff]  ;;  %vm45_vm1 = vcmask 130048  }
  0x27   :  { %441 = vmatprep.subr.bf16.mxu1 %v552_v0  ;;  %400 = vmatprep.mubr.msk.f32.mxu1 %vm553_vm0, %v554_v1  ;;  %v439_v4 = vpack.c.bf16 %v40_v3, %v39_v2  ;;  %v122_v7 = vld [vmem:[#allocation4 + $0x20] sm:$0xff]  ;;  %v442_v8 = vpack.c.bf16 %v121_v6, %v120_v5  ;;  %v123_v9 = vld [vmem:[#allocation4 + $0x28] sm:$0xff]  ;;  %v37_v10 = vld [vmem:[#allocation2] sm:$0xff]  ;;  %v42_v52 = vshrl.u32 %v41_v51, 7  ;;  %v302_v6 = vand.u32 127, %v41_v51 }
  0x28   :  { %v445_v11 = vpack.c.bf16 %v123_v9, %v122_v7  ;;  %v124_v12 = vld [vmem:[#allocation4 + $0x30] sm:$0xff]  ;;  %v125_v13 = vld [vmem:[#allocation4 + $0x38] sm:$0xff]  ;;  %v126_v15 = vld [vmem:[#allocation4 + $0x40] sm:$0xff] }
  0x29   :  { %440 = vmatpush3.bf16.msra.mxu0 %v439_v4  ;;  %443 = vmatpush3.bf16.msra.mxu1 %v442_v8  ;;  %v448_v14 = vpack.c.bf16 %v125_v13, %v124_v12  ;;  %v127_v16 = vld [vmem:[#allocation4 + $0x48] sm:$0xff]  ;;  %v128_v18 = vld [vmem:[#allocation4 + $0x50] sm:$0xff]  ;;  %v129_v19 = vld [vmem:[#allocation4 + $0x58] sm:$0xff]  ;;  %v43_v53 = vsub.s32 0, %v42_v52  ;;  %v138_v63 = vsub.s32 1, %v42_v52  ;;  %v229_v5 = vsub.s32 2, %v42_v52 }
  0x2a   :  { %465 = vmatprep.subr.bf16.mxu0 %v552_v0  ;;  %444 = vmatprep.subr.bf16.mxu1 %v552_v0  ;;  %v451_v17 = vpack.c.bf16 %v127_v16, %v126_v15  ;;  %v454_v20 = vpack.c.bf16 %v129_v19, %v128_v18  ;;  %v130_v21 = vld [vmem:[#allocation4 + $0x60] sm:$0xff]  ;;  %v131_v22 = vld [vmem:[#allocation4 + $0x68] sm:$0xff]  ;;  %v132_v24 = vld [vmem:[#allocation4 + $0x70] sm:$0xff]  ;;  %vm303_vm2 = vcmp.lt.s32.totalorder %v302_v6, 4  ;;  %vm314_vm3 = vcmp.eq.s32.totalorder %v302_v6, 4 }
  0x2b   :  { %v457_v23 = vpack.c.bf16 %v131_v22, %v130_v21  ;;  %v133_v25 = vld [vmem:[#allocation4 + $0x78] sm:$0xff]  ;;  %v134_v27 = vld [vmem:[#allocation4 + $0x80] sm:$0xff]  ;;  %v135_v28 = vld [vmem:[#allocation4 + $0x88] sm:$0xff] }
  0x2c   :  { %366 = vmatmul.mubr.msk.f32.vlgmr.msra.gmra.mrb[0].mxu0 %vm45_vm1, %v37_v10  ;;  %v460_v26 = vpack.c.bf16 %v133_v25, %v132_v24  ;;  %v463_v29 = vpack.c.bf16 %v135_v28, %v134_v27  ;;  %v211_v30 = vld [vmem:[#allocation4 + $0x90] sm:$0xff]  ;;  %v212_v31 = vld [vmem:[#allocation4 + $0x98] sm:$0xff]  ;;  %v213_v32 = vld [vmem:[#allocation4 + $0xa0] sm:$0xff] }
  0x2d   :  { %435 = vmatprep.mubr.msk.f32.mxu0 %vm553_vm0, %v554_v1  ;;  %446 = vmatpush3.bf16.msra.mxu1 %v445_v11  ;;  %v466_v33 = vpack.c.bf16 %v212_v31, %v211_v30  ;;  %v214_v34 = vld [vmem:[#allocation4 + $0xa8] sm:$0xff]  ;;  %v215_v36 = vld [vmem:[#allocation4 + $0xb0] sm:$0xff]  ;;  %v216_v37 = vld [vmem:[#allocation4 + $0xb8] sm:$0xff] }
  0x2e   :  { %447 = vmatprep.subr.bf16.mxu1 %v552_v0  ;;  %v469_v35 = vpack.c.bf16 %v214_v34, %v213_v32  ;;  %v472_v38 = vpack.c.bf16 %v216_v37, %v215_v36  ;;  %v217_v39 = vld [vmem:[#allocation4 + $0xc0] sm:$0xff]  ;;  %v218_v40 = vld [vmem:[#allocation4 + $0xc8] sm:$0xff]  ;;  %v219_v42 = vld [vmem:[#allocation4 + $0xd0] sm:$0xff] }
  0x2f   :  { %467 = vmatpush3.bf16.msra.mxu0 %v466_v33  ;;  %v475_v41 = vpack.c.bf16 %v218_v40, %v217_v39  ;;  %v220_v43 = vld [vmem:[#allocation4 + $0xd8] sm:$0xff]  ;;  %v221_v45 = vld [vmem:[#allocation4 + $0xe0] sm:$0xff]  ;;  %v222_v46 = vld [vmem:[#allocation4 + $0xe8] sm:$0xff] }
  0x30   :  { %468 = vmatprep.subr.bf16.mxu0 %v552_v0  ;;  %v478_v44 = vpack.c.bf16 %v220_v43, %v219_v42  ;;  %v481_v47 = vpack.c.bf16 %v222_v46, %v221_v45  ;;  %v223_v48 = vld [vmem:[#allocation4 + $0xf0] sm:$0xff]  ;;  %v224_v49 = vld [vmem:[#allocation4 + $0xf8] sm:$0xff]  ;;  %v225_v60 = vld [vmem:[#allocation4 + $0x100] sm:$0xff] }
  0x31   :  { %449 = vmatpush3.bf16.msra.mxu1 %v448_v14  ;;  %v484_v50 = vpack.c.bf16 %v224_v49, %v223_v48  ;;  %v38_v54 = vld [vmem:[#allocation4 + $0x110] sm:$0xff]  ;;  %v226_v61 = vld [vmem:[#allocation4 + $0x108] sm:$0xff] }
  0x32   :  { %450 = vmatprep.subr.bf16.mxu1 %v552_v0  ;;  %v44_v55 = vrot.slane %v38_v54, %v43_v53  ;;  %v487_v62 = vpack.c.bf16 %v226_v61, %v225_v60  ;;  %v139_v1 = vrot.slane %v38_v54, %v138_v63  ;;  %v230_v7 = vrot.slane %v38_v54, %v229_v5 }
  0x33   :  { %470 = vmatpush3.bf16.msra.mxu0 %v469_v35 }
  0x34   :  { %471 = vmatprep.subr.bf16.mxu0 %v552_v0 }
  0x35   :  { %452 = vmatpush3.bf16.msra.mxu1 %v451_v17 }
  0x36   :  { %453 = vmatprep.subr.bf16.mxu1 %v552_v0 }
  0x37   :  { %473 = vmatpush3.bf16.msra.mxu0 %v472_v38 }
  0x38   :  { %474 = vmatprep.subr.bf16.mxu0 %v552_v0 }
  0x39   :  { %455 = vmatpush3.bf16.msra.mxu1 %v454_v20 }
  0x3a   :  { %456 = vmatprep.subr.bf16.mxu1 %v552_v0 }
  0x3b   :  { %476 = vmatpush3.bf16.msra.mxu0 %v475_v41 }
  0x3c   :  { %477 = vmatprep.subr.bf16.mxu0 %v552_v0 }
  0x3d   :  { %458 = vmatpush3.bf16.msra.mxu1 %v457_v23 }
  0x3e   :  { %459 = vmatprep.subr.bf16.mxu1 %v552_v0 }
  0x3f   :  { %479 = vmatpush3.bf16.msra.mxu0 %v478_v44 }
  0x40   :  { %480 = vmatprep.subr.bf16.mxu0 %v552_v0 }
  0x41   :  { %461 = vmatpush3.bf16.msra.mxu1 %v460_v26 }
  0x42   :  { %462 = vmatprep.subr.bf16.mxu1 %v552_v0 }
  0x43   :  { %482 = vmatpush3.bf16.msra.mxu0 %v481_v47 }
  0x44   :  { %483 = vmatprep.subr.bf16.mxu0 %v552_v0 }
  0x45   :  { %464 = vmatpush3.bf16.msra.mxu1 %v463_v29 }
  0x47   :  { %485 = vmatpush3.bf16.msra.mxu0 %v484_v50 }
  0x48   :  { %486 = vmatprep.subr.bf16.mxu0 %v552_v0 }
  0x4b   :  { %488 = vmatpush3.bf16.msra.mxu0 %v487_v62 }
  0xff   :  { %v115_v56 = vpop.f32.mrb[0].mxu0 }
 0x100   :  { %v116_v57 = vadd.f32 %v115_v56, %v44_v55  ;;  %v367_v58 = vpop.f32.mrb[1].mxu0 }
 0x102   :  { %v119_v59 = vmax.f32 %v116_v57, 0.0 }
 0x104   :  { %401 = vmatmul.mubr.f32.vlgmr.msra.gmra.mrb[0].mxu1 %v119_v59 }
 0x1d7   :  { %v206_v2 = vpop.f32.mrb[0].mxu1 }
 0x1d8   :  { %v207_v3 = vadd.f32 %v206_v2, %v139_v1  ;;  %v402_v4 = vpop.f32.mrb[1].mxu1 }
 0x1da   :  { %v210_v0 = vmax.f32 %v207_v3, 0.0 }
 0x1dc   :  { %436 = vmatmul.mubr.f32.vlgmr.msra.gmra.mrb[2].mxu0 %v210_v0 }
 0x2af   :  { %v297_v8 = vpop.f32.mrb[2].mxu0 }
 0x2b0   :  { %v298_v9 = vadd.f32 %v297_v8, %v230_v7  ;;  %v437_v10 = vpop.f32.mrb[3].mxu0 }
 0x2b2   :  { %v304_v11 = vsel %vm303_vm2, %v298_v9, -1e+30 }
 0x2b3   :  { %305 = vmax.xlane.f32.xlu0 %v304_v11 }
 0x340   :  { %v306_v12 = vpop.xlane.xlu0 %305 }
 0x341   :  { %v307_v13 = vsub.f32 %v304_v11, %v306_v12 }
 0x343   :  { %v308_v14 = vmul.f32 1.442695, %v307_v13 }
 0x345   :  { %496 = vpow2.f32 %v308_v14 }
 0x34f   :  { %v497_v15 = vpop.eup %496 }
 0x350   :  { %310 = vadd.xlane.f32.xlu0 %v497_v15 }
 0x3dd   :  { %v311_v16 = vpop.xlane.xlu0 %310 }
 0x3de   :  { %498 = vrcp.f32 %v311_v16 }
 0x3e8   :  { %v499_v17 = vpop.eup %498 }
 0x3e9   :  { %v313_v18 = vmul.f32 %v499_v17, %v497_v15 }
 0x3eb   :  { %v315_v19 = vsel %vm314_vm3, %v298_v9, %v313_v18 }
 0x3ec   :  { %316 = vst [vmem:[%s626_s2] sm:$0xff] %v315_v19 }
 0x3ed   :  { %321 = vsyncpa [#allocation3], 1 }
 0x3ee   :  { %322 = vsyncpa [#allocation5], 1 }

</bundles_post_ra>
